<compile_context>
chip_gen: v6e
topology: v6e:2x2x1
jax: 0.10.0
libtpu: 0.0.40
codegen_flags: <defaults>
</compile_context>

<pallas_src>
import math
import itertools
import numpy as np
import jax
import jax.numpy as jnp
from jax.experimental import pallas as pl
from jax.experimental.pallas import tpu as pltpu


_MIN_TM = 128                         # minimum row tile (sublane aligned)
_MIN_ROWS_FOR_PALLAS = 2 * _MIN_TM    # below this, XLA fallback is faster


# ----------------------------------------------------------------------------
# Pallas kernels: one MXU matmul per row tile, contraction = (padded) KV*C_in.
# ----------------------------------------------------------------------------
def _conv_rows_kernel(x_ref, w_ref, o_ref):
    o_ref[...] = jnp.dot(
        x_ref[...], w_ref[...], preferred_element_type=jnp.float32
    ).astype(o_ref.dtype)


def _conv_rows_bias_kernel(x_ref, w_ref, b_ref, o_ref):
    # NOTE: rows that exist only for tile padding also receive the bias; the
    # wrapper slices them away, so nothing downstream may read the padded rows.
    o_ref[...] = (
        jnp.dot(x_ref[...], w_ref[...], preferred_element_type=jnp.float32)
        + b_ref[...]
    ).astype(o_ref.dtype)


# ----------------------------------------------------------------------------
# Generation-aware helpers
# ----------------------------------------------------------------------------
def _vmem_capacity_bytes():
    try:
        return int(pltpu.get_tpu_info().vmem_capacity_bytes)
    except Exception:
        return 64 * 2**20            # conservative default (v7x per-TC VMEM)


def _compiler_params(**kwargs):
    cls = getattr(pltpu, "CompilerParams", None)
    if cls is None:                  # older jax spelling
        cls = getattr(pltpu, "TPUCompilerParams")
    return cls(**kwargs)


def _block_spec(shape, index_map, buffer_count=None):
    """BlockSpec with optional buffer count (single-buffer constant blocks)."""
    if buffer_count is not None:
        try:
            return pl.BlockSpec(shape, index_map,
                                pipeline_mode=pl.Buffered(buffer_count))
        except Exception:            # jax without pipeline_mode / Buffered
            pass
    return pl.BlockSpec(shape, index_map)


def _pick_tm(n_rows, row_bytes, vmem_cap):
    """Row tile: as big as the per-tile budget allows, but keep >= 2 grid steps
    so the 'parallel' row axis can be sharded across both v7x TensorCores."""
    big_vmem = vmem_cap >= 100 * 2**20          # 128-MiB parts (v5e / v6e)
    tm = 1024 if big_vmem else 512
    tile_budget = (16 if big_vmem else 8) * 2**20
    while tm > _MIN_TM and tm * row_bytes > tile_budget:
        tm //= 2
    while tm > _MIN_TM and pl.cdiv(n_rows, tm) < 2:
        tm //= 2
    return tm


def _pad_kernel_volume(kv, c_in, max_blowup=1.35):
    """Smallest kv' >= kv with (kv' * c_in) % 128 == 0 if the extra gather cost
    is acceptable; otherwise keep kv (unaligned KC is still correct)."""
    step = 128 // math.gcd(c_in, 128)
    kv_pad = ((kv + step - 1) // step) * step
    if kv_pad == kv:
        return kv
    if kv_pad <= int(math.ceil(kv * max_blowup)):
        return kv_pad
    return kv


def _round_up(x, m):
    return ((x + m - 1) // m) * m


# ----------------------------------------------------------------------------
# pallas_call wrapper
# ----------------------------------------------------------------------------
def sparse_conv_rows_pallas(x_rows, weight2d, bias_row=None, *, tm, vmem_cap):
    """x_rows: (N_pad, KC) bf16, weight2d: (KC, C_out_pad) bf16,
    bias_row: (1, C_out_pad) f32 or None.  Returns (N_pad, C_out_pad) f32."""
    n_pad, kc = x_rows.shape
    c_out_pad = weight2d.shape[-1]
    assert n_pad % tm == 0
    assert c_out_pad % 128 == 0                       # lane-dense output stores

    w_bytes = kc * c_out_pad * weight2d.dtype.itemsize
    # Single-buffer the resident weight only when it is big enough to matter
    # (frees several MiB on the 64-MiB v7x parts); small weights keep defaults.
    w_bufs = 1 if w_bytes > 2 * 2**20 else None

    in_specs = [
        pl.BlockSpec((tm, kc), lambda i: (i, 0)),            # pipelined row tile
        _block_spec((kc, c_out_pad), lambda i: (0, 0), w_bufs),  # resident weight
    ]
    args = [x_rows, weight2d]
    kernel = _conv_rows_kernel
    if bias_row is not None:
        in_specs.append(pl.BlockSpec((1, c_out_pad), lambda i: (0, 0)))
        args.append(bias_row)
        kernel = _conv_rows_bias_kernel

    # VMEM budget: double-buffered x tile + resident weight/bias +
    # double-buffered output tile + headroom, capped at 75% of physical VMEM
    # (~48 MiB on 64-MiB v7x, ~96 MiB on 128-MiB v5e/v6e).
    need = (2 * tm * kc * x_rows.dtype.itemsize
            + 2 * w_bytes
            + 2 * tm * c_out_pad * 4
            + 2 * c_out_pad * 4
            + 8 * 2**20)
    vmem_limit = int(min(int(0.75 * vmem_cap), max(32 * 2**20, need)))

    return pl.pallas_call(
        kernel,
        out_shape=jax.ShapeDtypeStruct((n_pad, c_out_pad), jnp.float32),
        grid=(n_pad // tm,),
        in_specs=in_specs,
        out_specs=pl.BlockSpec((tm, c_out_pad), lambda i: (i, 0)),
        compiler_params=_compiler_params(
            dimension_semantics=("parallel",),
            vmem_limit_bytes=vmem_limit,
        ),
    )(*args)


# ----------------------------------------------------------------------------
# JAX-side module mirroring the PyTorch Conv3d (forward pass only)
# ----------------------------------------------------------------------------
class Conv3dPallas:
    def __init__(self, in_channels, out_channels, kernel_size=3, stride=1,
                 bias=False, transposed=False, *, key):
        assert kernel_size in [1, 2, 3]
        assert stride in [1, 2]
        self.in_channels = in_channels
        self.out_channels = out_channels
        self.kernel_size = kernel_size
        self.stride = stride
        self.transposed = transposed
        self.kernel_volume = kernel_size ** 3

        std = 1.0 / math.sqrt(
            (out_channels if transposed else in_channels) * self.kernel_volume)
        k_key, b_key = jax.random.split(key)
        if self.kernel_volume > 1:
            kshape = (self.kernel_volume, in_channels, out_channels)
        else:
            kshape = (in_channels, out_channels)
        self.kernel = jax.random.uniform(k_key, kshape, jnp.float32,
                                         minval=-std, maxval=std)
        self.bias = (jax.random.uniform(b_key, (out_channels,), jnp.float32,
                                        minval=-std, maxval=std)
                     if bias else None)

    def forward(self, feat, feat_depth, neighbor_idx=None, *, force_pallas=False):
        """feat: (N, C_in) f32.  neighbor_idx: (KV, N_out) int32; entry (k, n) is
        the row of `feat` contributing at kernel offset k for output n, or -1 if
        that neighbour does not exist (src/tgt maps from hash_tree.get_neighbours)."""
        n_in, c_in = feat.shape
        assert c_in == self.in_channels
        c_out = self.out_channels
        pointwise = (self.kernel_size == 1 and self.stride == 1)

        if pointwise:
            n_out = n_in
            output_depth = feat_depth
        else:
            # TODO(synk): hash_tree.get_neighbours() has no Pallas equivalent;
            # the neighbour index map is built on the host and passed in.
            assert neighbor_idx is not None
            kv, n_out = neighbor_idx.shape
            assert kv == self.kernel_volume
            if self.stride == 1:
                output_depth = feat_depth
            else:
                output_depth = feat_depth - 1 if self.transposed else feat_depth + 1

        # ---- small-problem fallback: pallas fixed cost + padding dominate ----
        if n_out < _MIN_ROWS_FOR_PALLAS and not force_pallas:
            if pointwise:
                out = feat @ self.kernel.reshape(c_in, c_out)
            else:
                feat_z = jnp.concatenate(
                    [feat, jnp.zeros((1, c_in), feat.dtype)], axis=0)
                safe = jnp.where(neighbor_idx < 0, n_in, neighbor_idx)
                out = jnp.einsum("knc,kcd->nd", feat_z[safe], self.kernel)
            if self.bias is not None:
                out = out + self.bias
            return out, output_depth

        # ---- Pallas path -----------------------------------------------------
        vmem_cap = _vmem_capacity_bytes()

        if pointwise:
            kc = c_in
            w2d = self.kernel.reshape(c_in, c_out)
        else:
            kv_pad = _pad_kernel_volume(kv, c_in)      # 128-aligned contraction
            kc = kv_pad * c_in
            w3 = self.kernel
            if kv_pad > kv:
                w3 = jnp.concatenate(
                    [w3, jnp.zeros((kv_pad - kv, c_in, c_out), w3.dtype)], axis=0)
            w2d = w3.reshape(kc, c_out)

        # Lane-dense output stores: pad C_out to a multiple of 128.
        c_out_pad = _round_up(c_out, 128)
        if c_out_pad > c_out:
            w2d = jnp.pad(w2d, ((0, 0), (0, c_out_pad - c_out)))

        tm = _pick_tm(n_out, kc * 2, vmem_cap)         # bf16 rows
        n_pad = pl.cdiv(n_out, tm) * tm

        if pointwise:
            # feat itself is small (no KV blow-up); padding it is cheap.
            x_rows = feat.astype(jnp.bfloat16)
            if n_pad > n_out:
                x_rows = jnp.pad(x_rows, ((0, n_pad - n_out), (0, 0)))
        else:
            # Fold BOTH paddings into the index array so the KV-times blown-up
            # operand is materialised exactly once by the gather (no jnp.pad on
            # the gathered array).
            safe = jnp.where(neighbor_idx < 0, n_in, neighbor_idx).astype(jnp.int32)
            if kv_pad > kv:        # extra kernel offsets -> zero row
                safe = jnp.concatenate(
                    [safe, jnp.full((kv_pad - kv, n_out), n_in, jnp.int32)], axis=0)
            if n_pad > n_out:      # extra output rows -> zero row
                safe = jnp.concatenate(
                    [safe, jnp.full((kv_pad, n_pad - n_out), n_in, jnp.int32)], axis=1)
            feat_z = jnp.concatenate(
                [feat, jnp.zeros((1, c_in), feat.dtype)], axis=0).astype(jnp.bfloat16)
            # TODO(synk): gather stays in XLA (see header note on in-kernel gather).
            gathered = jnp.take(feat_z, safe.T, axis=0)     # (n_pad, kv_pad, c_in)
            x_rows = gathered.reshape(n_pad, kc)

        w2d = w2d.astype(jnp.bfloat16)
        bias_row = None
        if self.bias is not None:
            bias_row = jnp.pad(self.bias, (0, c_out_pad - c_out)).reshape(
                1, c_out_pad).astype(jnp.float32)

        out = sparse_conv_rows_pallas(x_rows, w2d, bias_row,
                                      tm=tm, vmem_cap=vmem_cap)
        return out[:n_out, :c_out], output_depth


# ----------------------------------------------------------------------------
# Host-side neighbour-map construction (stands in for hash_tree.get_neighbours)
# ----------------------------------------------------------------------------
def build_neighbor_idx(coords, kernel_size):
    """coords: (N, 3) int.  stride=1, non-transposed: output coords == input
    coords.  Returns (K^3, N) int32 index map into coords (or -1 if missing)."""
    lut = {tuple(c): i for i, c in enumerate(coords.tolist())}
    if kernel_size == 3:
        offs = list(itertools.product([-1, 0, 1], repeat=3))
    elif kernel_size == 2:
        offs = list(itertools.product([0, 1], repeat=3))
    else:
        offs = [(0, 0, 0)]
    n = coords.shape[0]
    idx = np.full((len(offs), n), -1, dtype=np.int32)
    for k, o in enumerate(offs):
        for i, c in enumerate(coords):
            src = (int(c[0]) + o[0], int(c[1]) + o[1], int(c[2]) + o[2])
            if src in lut:
                idx[k, i] = lut[src]
    return idx


if __name__ == "__main__":
    key = jax.random.PRNGKey(0)
    k_feat, k_mod, k_mod1, k_feat1 = jax.random.split(key, 4)

    # --- main test: 3x3x3 sparse conv over an 8^3 voxel block (N = 512) ------
    in_channels, out_channels, kernel_size = 8, 16, 3
    G = 8
    coords = np.array(list(itertools.product(range(G), repeat=3)), dtype=np.int32)
    N = coords.shape[0]                                    # 512
    feat = jax.random.normal(k_feat, (N, in_channels), jnp.float32)
    neighbor_idx = jnp.asarray(build_neighbor_idx(coords, kernel_size))

    conv = Conv3dPallas(in_channels, out_channels, kernel_size=kernel_size,
                        stride=1, bias=True, transposed=False, key=k_mod)
    out, out_depth = conv.forward(feat, feat_depth=3, neighbor_idx=neighbor_idx)
    out = jax.block_until_ready(out)
    assert out.shape == (N, out_channels)
    assert out_depth == 3

    # Pure-JAX reference on the same bf16-rounded operands, f32 accumulation.
    feat_z = jnp.concatenate([feat, jnp.zeros((1, in_channels))], axis=0)
    feat_b = feat_z.astype(jnp.bfloat16).astype(jnp.float32)
    w_b = conv.kernel.astype(jnp.bfloat16).astype(jnp.float32)
    safe = jnp.where(neighbor_idx < 0, N, neighbor_idx)
    ref = jnp.einsum("knc,kcd->nd", feat_b[safe], w_b,
                     precision=jax.lax.Precision.HIGHEST) + conv.bias
    np.testing.assert_allclose(np.asarray(out), np.asarray(ref),
                               rtol=2e-4, atol=2e-4)

    # --- secondary test: pointwise conv, small N -> XLA fallback path --------
    conv1 = Conv3dPallas(in_channels, out_channels, kernel_size=1,
                         stride=1, bias=False, key=k_mod1)
    feat_small = jax.random.normal(k_feat1, (100, in_channels), jnp.float32)
    out1, depth1 = conv1.forward(feat_small, feat_depth=2)
    out1 = jax.block_until_ready(out1)
    ref1 = feat_small @ conv1.kernel
    assert depth1 == 2
    np.testing.assert_allclose(np.asarray(out1), np.asarray(ref1),
                               rtol=1e-5, atol=1e-5)

    print("KERNEL_OK")
</pallas_src>

<mosaic_0001>
module attributes {stable_mosaic.version = 11 : i64} {
  func.func @_conv_rows_bias_kernel(%arg0: i32, %arg1: memref<256x256xbf16, #tpu.memory_space<vmem>>, %arg2: memref<256x128xbf16, #tpu.memory_space<vmem>>, %arg3: memref<1x128xf32, #tpu.memory_space<vmem>>, %arg4: memref<256x128xf32, #tpu.memory_space<vmem>>) attributes {dimension_semantics = [#tpu.dimension_semantics<parallel>], iteration_bounds = array<i64: 2>, scalar_prefetch = 0 : i64, scratch_operands = 0 : i64, tpu.core_type = #tpu.core_type<tc>, window_params = [{transform_indices = @transform_0, window_bounds = array<i64: 256, 256>}, {pipeline_mode = #tpu.pipeline_mode<synchronous>, transform_indices = @transform_1, window_bounds = array<i64: 256, 128>}, {pipeline_mode = #tpu.pipeline_mode<synchronous>, transform_indices = @transform_2, window_bounds = array<i64: 1, 128>}, {transform_indices = @transform_3, window_bounds = array<i64: 256, 128>}]} {
    %c0 = arith.constant 0 : index
    %c0_0 = arith.constant 0 : index
    %0 = vector.load %arg1[%c0, %c0_0] : memref<256x256xbf16, #tpu.memory_space<vmem>>, vector<256x256xbf16>
    %c0_1 = arith.constant 0 : index
    %c0_2 = arith.constant 0 : index
    %1 = vector.load %arg2[%c0_1, %c0_2] : memref<256x128xbf16, #tpu.memory_space<vmem>>, vector<256x128xbf16>
    %cst = arith.constant dense<0.000000e+00> : vector<256x128xf32>
    %2 = tpu.matmul %0, %1, %cst {dimension_numbers = #tpu.dot_dimension_numbers<[1], [0], [0], [1], [0, 0, 1, 1], [], []>} : vector<256x256xbf16>, vector<256x128xbf16>, vector<256x128xf32> -> vector<256x128xf32>
    %c0_3 = arith.constant 0 : index
    %c0_4 = arith.constant 0 : index
    %3 = vector.load %arg3[%c0_3, %c0_4] : memref<1x128xf32, #tpu.memory_space<vmem>>, vector<1x128xf32>
    %4 = vector.broadcast %3 : vector<1x128xf32> to vector<256x128xf32>
    %5 = arith.addf %2, %4 : vector<256x128xf32>
    %c0_5 = arith.constant 0 : index
    %c0_6 = arith.constant 0 : index
    %6 = vector.load %arg4[%c0_5, %c0_6] : memref<256x128xf32, #tpu.memory_space<vmem>>, vector<256x128xf32>
    tpu.vector_store %arg4[%c0_5, %c0_6], %5 {strides = array<i32>} : memref<256x128xf32, #tpu.memory_space<vmem>>, vector<256x128xf32>,
    return
  }
  func.func @transform_0(%arg0: i32) -> (i32, i32) {
    %c0_i32 = arith.constant 0 : i32
    %c0_i32_0 = arith.constant 0 : i32
    return %arg0, %c0_i32 : i32, i32
  }
  func.func @transform_1(%arg0: i32) -> (i32, i32) {
    %c0_i32 = arith.constant 0 : i32
    %c0_i32_0 = arith.constant 0 : i32
    %c0_i32_1 = arith.constant 0 : i32
    return %c0_i32, %c0_i32_0 : i32, i32
  }
  func.func @transform_2(%arg0: i32) -> (i32, i32) {
    %c0_i32 = arith.constant 0 : i32
    %c0_i32_0 = arith.constant 0 : i32
    %c0_i32_1 = arith.constant 0 : i32
    return %c0_i32, %c0_i32_0 : i32, i32
  }
  func.func @transform_3(%arg0: i32) -> (i32, i32) {
    %c0_i32 = arith.constant 0 : i32
    %c0_i32_0 = arith.constant 0 : i32
    return %arg0, %c0_i32 : i32, i32
  }
}

</mosaic_0001>

<bundles_post_ra>
// kernel: tpu_custom_call.1
= control target key start
LH: loop header
LB: loop body
LE: loop exit
PB: predicated region body
PF: predicated region fallthrough
CT: control target
= control target key end

     0   :  { %8 = vsyncpa [#allocation3], 0  ;;  %s1589_s0 = inlined_call_operand.hbm [shape: bf16[512,256], index: 0, kind: input, shape index: {}]   ;;  %s1590_s1 = inlined_call_operand.hbm [shape: bf16[256,128], index: 1, kind: input, shape index: {}]   ;;  %s1591_s2 = inlined_call_operand.vmem [shape: f32[1,128], index: 2, kind: input, shape index: {}]   ;;  %s1592_s3 = inlined_call_operand.hbm [shape: f32[512,128], index: 3, kind: output, shape index: {}]  }
   0x1   :  { %10 = vsyncpa [#allocation3 + $0x1], 0 }
   0x2   :  { %11 = vsyncpa [#allocation6], 0 }
   0x3   :  { %12 = vsyncpa [#allocation4], 0 }
   0x4   :  { %14 = vsyncpa [#allocation4 + $0x1], 0  ;;  %s1302_s12 = smov 0   ;;  %s1304_s13 = smov 0  }
   0x5   :  { %s1306_s14 = smov 0   ;;  %s1308_s15 = smov 0  }
   0x6 LB: > { %s1323_s16 = sadd.s32 4294967295, %s1271_s15   ;;  %s825_s17 = sadd.s32 4294967294, %s1271_s15   ;;  %s1271_s15 = sphi %s1308_s15, %s1614_s15   ;;  %s1267_s14 = sphi %s1306_s14, %s1613_s14   ;;  %s1263_s13 = sphi %s1304_s13, %s1612_s13   ;;  %s1259_s12 = sphi %s1302_s12, %s1611_s12  }
   0x7   : > { %p40_p0 = scmp.ne.s32.totalorder %s1263_s13, %s1259_s12  ;;  %p1593_p1 = scmp.eq.s32.totalorder %s1323_s16, 0 }
   0x8   : > { %p112_p3 = scmp.eq.s32.totalorder %s825_s17, 1  ;;  %p826_p5 = scmp.ge.s32.totalorder %s1271_s15, 1 }
   0x9   : > { %p1332_p4 = por %p1593_p1, %p40_p0  ;;  %p119_p7 = scmp.lt.s32.totalorder %s1271_s15, 3 }
   0xa   : > { %p1337_p6 = por %p112_p3, %p40_p0  ;;  %s1273_s21 = smov [#allocation5]  }
   0xb   : > { %s1597_s18 = scalar_select %p1332_p4, 1, 0 }
   0xc   : > { %s1598_s19 = scalar_select %p1337_p6, 1, 0 }
   0xd   : > { %p1342_p8 = pnand %p826_p5, %p119_p7  ;;  %s131_s22 = sshll.u32 %s1273_s21, 4  ;;  %s132_s22 = int_to_ptr.vmem [resolvable:$true] %s131_s22 }
   0xe   : > { %s1356_s24 = sadd.s32 1, %s1271_s15   ;;  %s27_s25 = sadd.s32 1, %s1267_s14 }
   0xf   : > { %s1599_s20 = scalar_select %p1342_p8, 1, 0 }
  0x10   : > { %p1030_p9 = pneg %p1342_p8  ;;  %s24_s26 = ssub.s32 %s1271_s15, %s1356_s24 }
  0x11   : > { %s1160_s27 = scalar_lea.vmem %s132_s22, 2048  ;;  %p1168_p5 = scmp.lt.s32.totalorder %s132_s22, %s132_s22 }
  0x12   : > { %p1351_p11 = pnand %p1030_p9, %p1593_p1  ;;  %p1161_p13 = scmp.ne.s32.totalorder %s132_s22, %s1160_s27 }
  0x13   : > { %p1169_p7 = scmp.lt.s32.totalorder %s1160_s27, %s1160_s27 }
  0x14   : > { %p1151_p12 = pneg %p1351_p11 }
  0x15   : > { %p1170_p10 = por %p1169_p7, %p1168_p5 }
  0x16   : > { %p1163_p0 = pnand %p1161_p13, %p1151_p12 }
  0x18   : > { %p1164_p3 = pneg %p1163_p0 }
  0x1a   : > { %p1171_p2 = pnand %p1170_p10, %p1164_p3 }
  0x1c   : > { %1174 = shalt.err (!%p1171_p2)
}
  0x1d   : > { %s1274_s28 = smov 64   ;;  %s1275_s29 = smov 4  }
  0x1e   : > { %1033 = dma.hbm_to_vmem [thread:$0]  (!%p1351_p11), %s1590_s1, 2048, %s132_s22, [#allocation6], %s1274_s28, %s1274_s28, %s1275_s29  }
  0x1f   : > { %p25_p9 = scmp.eq.s32.totalorder %s24_s26, 0  ;;  %p34_p12 = scmp.ne.s32.totalorder %s1267_s14, %s1263_s13 }
  0x20   : > { %p35_p10 = scmp.eq.s32.totalorder %s1271_s15, 0  ;;  %p1043_p2 = scmp.lt.s32.totalorder %s1271_s15, 2 }
  0x21   : > { %s1373_s5 = scalar_select %p25_p9, %s1267_s14, %s27_s25  }
  0x22   : > { %p36_p13 = por %p35_p10, %p34_p12  ;;  %p1601_p0 = scmp.eq.s32.totalorder %s1323_s16, 1 }
  0x23   : > { %s148_s7 = sand.u32 1, %s1267_s14   ;;  %s892_s8 = sshll.u32 %s1271_s15, 12 }
  0x24   : > { %p1377_p3 = por %p1601_p0, %p34_p12  ;;  %s829_s9 = sshll.u32 %s148_s7, 8 }
  0x25   : > { %s1386_s17 = scalar_lea.hbm %s1589_s0, %s892_s8  ;;  %s152_s21 = scalar_lea.vmem [#allocation2], %s829_s9 }
  0x26   : > { %s1602_s6 = scalar_select %p1377_p3, 1, 0 }
  0x27   : > { %s160_s22 = sshll.u32 %s152_s21, 4  ;;  %p1388_p11 = pnand %p1043_p2, %p36_p13  ;;  %s1392_s22 = int_to_ptr.vmem [resolvable:$true] %s160_s22 }
  0x28   : > { %s1394_s25 = scalar_lea.sflag [#allocation3], %s148_s7  ;;  %s1175_s26 = scalar_lea.hbm %s1386_s17, 4096 }
  0x29   : > { %p1176_p5 = scmp.ne.s32.totalorder %s1386_s17, %s1175_s26  ;;  %p1177_p7 = pneg %p1388_p11 }
  0x2a   : > { %s1180_s29 = scalar_lea.hbm %s1589_s0, 8192  ;;  %p1181_p10 = scmp.lt.s32.totalorder %s1386_s17, %s1589_s0 }
  0x2b   : > { %p1178_p9 = pnand %p1177_p7, %p1176_p5  ;;  %p1182_p2 = scmp.lt.s32.totalorder %s1180_s29, %s1175_s26 }
  0x2d   : > { %p1179_p12 = pneg %p1178_p9  ;;  %p1183_p13 = por %p1182_p2, %p1181_p10 }
  0x2f   : > { %p1184_p0 = pnand %p1183_p13, %p1179_p12 }
  0x31   : > { %1187 = shalt.err (!%p1184_p0)
}
  0x32   : > { %s1188_s7 = scalar_lea.vmem %s1392_s22, 4096  ;;  %s1276_s8 = smov [#allocation2]  }
  0x33   : > { %p1189_p1 = scmp.ne.s32.totalorder %s1392_s22, %s1188_s7  ;;  %s1193_s9 = sshll.u32 %s1276_s8, 4  ;;  %s1194_s9 = int_to_ptr.vmem [resolvable:$false] %s1193_s9 }
  0x34   : > { %s1195_s10 = scalar_lea.vmem %s1194_s9, 8192  ;;  %p1196_p9 = scmp.lt.s32.totalorder %s1392_s22, %s1194_s9 }
  0x35   : > { %p1191_p6 = pnand %p1189_p1, %p1177_p7  ;;  %p1197_p3 = scmp.lt.s32.totalorder %s1195_s10, %s1188_s7 }
  0x37   : > { %p1192_p5 = pneg %p1191_p6  ;;  %p1198_p4 = por %p1197_p3, %p1196_p9 }
  0x39   : > { %p1199_p8 = pnand %p1198_p4, %p1192_p5 }
  0x3b   : > { %1202 = shalt.err (!%p1199_p8)
}
  0x3c   : > { %s1277_s11 = smov 128   ;;  %s1278_s21 = smov 8  }
  0x3d   : > { %1037 = dma.hbm_to_vmem [thread:$0]  (!%p1388_p11), %s1386_s17, 4096, %s1392_s22, %s1394_s25, %s1277_s11, %s1277_s11, %s1278_s21  }
  0x3e   : > { %p1604_p1 = scmp.ne.s32.totalorder %s1599_s20, 0 }
  0x3f   : > { %s1418_s26 = sand.u32 (!%p1604_p1), 1, %s1263_s13   ;;  %p1605_p4 = scmp.ne.s32.totalorder (!%p1604_p1), %s1597_s18, 0 }
  0x40   : > { %172 = sbr.rel (%p1604_p1) target bundleno = 379 (0x17b), region = 32  ;;  %s834_s27 = sshll.u32 (!%p1604_p1), %s1418_s26, 8 }
  0x41   : > { %s175_s28 = scalar_lea.sflag (!%p1604_p1), [#allocation3], %s1418_s26  ;;  %s1424_s29 = scalar_lea.vmem (!%p1604_p1), [#allocation2], %s834_s27 }
  0x45   : > { %1246 = dma.done.wait (%p1605_p4), %s175_s28, 4096  }
  0x46   : > { %1248 = vsyncadd (%p1605_p4), %s175_s28, 4294963200  ;;  %p1606_p6 = scmp.eq.s32.totalorder %s1323_s16, 0 }
  0x48   : > { %1250 = dma.done.wait (%p1606_p6), [#allocation6], 2048   ;;  %p1607_p8 = pmov %p1606_p6 }
  0x49   : > { %v1085_v0 = vld [vmem:[#allocation5 + $0x78] sm:$0xff]   ;;  %v1087_v2 = vld [vmem:[#allocation5 + $0x70] sm:$0xff]   ;;  %v1089_v4 = vld [vmem:[#allocation5 + $0x68] sm:$0xff]   ;;  %s1475_s17 = scalar_lea.vmem [#allocation7], %s834_s27  ;;  %s893_s22 = sshll.u32 %s1323_s16, 12 }
  0x4a   : > { %1252 = vsyncadd (%p1607_p8), [#allocation6], 4294965248  ;;  %v1086_v1 = vld [vmem:[#allocation5 + $0x38] sm:$0xff]   ;;  %894 = vmatprep.subr.bf16.mxu0 %v1085_v0  ;;  %1006 = vmatprep.subr.bf16.mxu1 %v1085_v0  ;;  %v1088_v3 = vld [vmem:[#allocation5 + $0x30] sm:$0xff]   ;;  %s742_s23 = sshll.u32 %s1475_s17, 4  ;;  %s1540_s4 = scalar_lea.hbm %s1592_s3, %s893_s22  ;;  %s1542_s23 = int_to_ptr.vmem [resolvable:$true] %s742_s23 }
  0x4b   : > { %895 = vmatpush3.bf16.msra.mxu0 %v1086_v1  ;;  %1014 = vmatpush3.bf16.msra.mxu1 %v1086_v1  ;;  %v1090_v5 = vld [vmem:[#allocation5 + $0x28] sm:$0xff]   ;;  %v1091_v6 = vld [vmem:[#allocation5 + $0x60] sm:$0xff]   ;;  %v1093_v8 = vld [vmem:[#allocation5 + $0x58] sm:$0xff]   ;;  %s729_s16 = scalar_lea.sflag [#allocation4], %s1418_s26  ;;  %s1203_s7 = scalar_lea.vmem %s1542_s23, 4096 }
  0x4c   : > { %896 = vmatprep.subr.bf16.mxu0 %v1087_v2  ;;  %1007 = vmatprep.subr.bf16.mxu1 %v1087_v2  ;;  %v1092_v7 = vld [vmem:[#allocation5 + $0x20] sm:$0xff]   ;;  %v1094_v9 = vld [vmem:[#allocation5 + $0x18] sm:$0xff]   ;;  %v1095_v10 = vld [vmem:[#allocation5 + $0x50] sm:$0xff]   ;;  %p1204_p3 = scmp.ne.s32.totalorder %s1542_s23, %s1203_s7  ;;  %p1608_p11 = scmp.ne.s32.totalorder %s1602_s6, 0 }
  0x4d   : > { %v1103_v11 = vld [vmem:[%s1424_s29 + $0x4] ss:$8 sps:$4 sm:$0xff]   ;;  %v1096_v13 = vld [vmem:[#allocation5 + $0x10] sm:$0xff]   ;;  %v1101_v18 = vld [vmem:[%s1424_s29] ss:$8 sps:$4 sm:$0xff]   ;;  %s1279_s8 = smov [#allocation7]  }
  0x4e   : > { %v1106_v12 = vld [vmem:[%s1424_s29 + $0x84] ss:$8 sps:$4 sm:$0xff]   ;;  %567 = vmatprep.mubr.bf16.mxu0 %v1103_v11  ;;  %v1104_v19 = vld [vmem:[%s1424_s29 + $0x80] ss:$8 sps:$4 sm:$0xff]   ;;  %v1107_v20 = vld [vmem:[%s1424_s29 + $0x14] ss:$8 sps:$4 sm:$0xff]   ;;  %p1205_p7 = pnand %p1204_p3, %p1608_p11 }
  0x4f   : > { %897 = vmatpush3.bf16.msra.mxu0 %v1088_v3  ;;  %1015 = vmatpush3.bf16.msra.mxu1 %v1088_v3  ;;  %v1097_v14 = vld [vmem:[#allocation5 + $0x48] sm:$0xff]   ;;  %v1099_v16 = vld [vmem:[#allocation5 + $0x40] sm:$0xff]   ;;  %v1109_v21 = vld [vmem:[%s1424_s29 + $0x94] ss:$8 sps:$4 sm:$0xff]   ;;  %s1207_s9 = sshll.u32 %s1279_s8, 4  ;;  %s1208_s9 = int_to_ptr.vmem [resolvable:$false] %s1207_s9 }
  0x50   : > { %898 = vmatprep.subr.bf16.mxu0 %v1089_v4  ;;  %1008 = vmatprep.subr.bf16.mxu1 %v1089_v4  ;;  %v1098_v15 = vld [vmem:[#allocation5 + $0x8] sm:$0xff]   ;;  %v1100_v17 = vld [vmem:[#allocation5] sm:$0xff]   ;;  %v1111_v22 = vld [vmem:[%s1424_s29 + $0x10] ss:$8 sps:$4 sm:$0xff]   ;;  %p1206_p12 = pneg %p1205_p7  ;;  %s1209_s10 = scalar_lea.vmem %s1208_s9, 8192 }
  0x51   : > { %631 = vmatprep.mubr.bf16.mxu1 %v1106_v12  ;;  %v1112_v23 = vld [vmem:[%s1424_s29 + $0x90] ss:$8 sps:$4 sm:$0xff]   ;;  %v1113_v24 = vld [vmem:[%s1424_s29 + $0x24] ss:$8 sps:$4 sm:$0xff]   ;;  %v1117_v26 = vld [vmem:[%s1424_s29 + $0x20] ss:$8 sps:$4 sm:$0xff]   ;;  %p1210_p10 = scmp.lt.s32.totalorder %s1542_s23, %s1208_s9  ;;  %p1211_p2 = scmp.lt.s32.totalorder %s1209_s10, %s1203_s7 }
  0x52   : > { %v1115_v25 = vld [vmem:[%s1424_s29 + $0xa4] ss:$8 sps:$4 sm:$0xff]   ;;  %v1118_v27 = vld [vmem:[%s1424_s29 + $0xa0] ss:$8 sps:$4 sm:$0xff]   ;;  %v1119_v28 = vld [vmem:[%s1424_s29 + $0x34] ss:$8 sps:$4 sm:$0xff]  }
  0x53   : > { %899 = vmatpush3.bf16.msra.mxu0 %v1090_v5  ;;  %1016 = vmatpush3.bf16.msra.mxu1 %v1090_v5  ;;  %v1121_v29 = vld [vmem:[%s1424_s29 + $0xb4] ss:$8 sps:$4 sm:$0xff]   ;;  %v1123_v30 = vld [vmem:[%s1424_s29 + $0x30] ss:$8 sps:$4 sm:$0xff]   ;;  %v1125_v32 = vld [vmem:[%s1424_s29 + $0x44] ss:$8 sps:$4 sm:$0xff]   ;;  %p1212_p13 = por %p1211_p2, %p1210_p10 }
  0x54   : > { %900 = vmatprep.subr.bf16.mxu0 %v1091_v6  ;;  %1009 = vmatprep.subr.bf16.mxu1 %v1091_v6  ;;  %v1124_v31 = vld [vmem:[%s1424_s29 + $0xb0] ss:$8 sps:$4 sm:$0xff]   ;;  %v1127_v33 = vld [vmem:[%s1424_s29 + $0xc4] ss:$8 sps:$4 sm:$0xff]   ;;  %v1129_v34 = vld [vmem:[%s1424_s29 + $0x40] ss:$8 sps:$4 sm:$0xff]  }
  0x55   : > { %v1130_v35 = vld [vmem:[%s1424_s29 + $0xc0] ss:$8 sps:$4 sm:$0xff]   ;;  %v1131_v36 = vld [vmem:[%s1424_s29 + $0x54] ss:$8 sps:$4 sm:$0xff]   ;;  %v1135_v38 = vld [vmem:[%s1424_s29 + $0x50] ss:$8 sps:$4 sm:$0xff]   ;;  %p1213_p0 = pnand %p1212_p13, %p1206_p12 }
  0x56   : > { %v1133_v37 = vld [vmem:[%s1424_s29 + $0xd4] ss:$8 sps:$4 sm:$0xff]   ;;  %v1136_v39 = vld [vmem:[%s1424_s29 + $0xd0] ss:$8 sps:$4 sm:$0xff]   ;;  %v1137_v40 = vld [vmem:[%s1424_s29 + $0x64] ss:$8 sps:$4 sm:$0xff]  }
  0x57   : > { %901 = vmatpush3.bf16.msra.mxu0 %v1092_v7  ;;  %1017 = vmatpush3.bf16.msra.mxu1 %v1092_v7  ;;  %v1139_v41 = vld [vmem:[%s1424_s29 + $0xe4] ss:$8 sps:$4 sm:$0xff]   ;;  %v1141_v42 = vld [vmem:[%s1424_s29 + $0x60] ss:$8 sps:$4 sm:$0xff]   ;;  %v1143_v44 = vld [vmem:[%s1424_s29 + $0x74] ss:$8 sps:$4 sm:$0xff]  }
  0x58   : > { %902 = vmatprep.subr.bf16.mxu0 %v1093_v8  ;;  %1010 = vmatprep.subr.bf16.mxu1 %v1093_v8  ;;  %v1142_v43 = vld [vmem:[%s1424_s29 + $0xe0] ss:$8 sps:$4 sm:$0xff]   ;;  %v1145_v45 = vld [vmem:[%s1424_s29 + $0xf4] ss:$8 sps:$4 sm:$0xff]   ;;  %v1147_v46 = vld [vmem:[%s1424_s29 + $0x70] ss:$8 sps:$4 sm:$0xff]  }
  0x59   : > { %v1148_v47 = vld [vmem:[%s1424_s29 + $0xf0] ss:$8 sps:$4 sm:$0xff]   ;;  %v1469_v50 = vld [vmem:[%s1591_s2] ss:$0 sm:$0xff] }
  0x5b   : > { %903 = vmatpush3.bf16.msra.mxu0 %v1094_v9  ;;  %1018 = vmatpush3.bf16.msra.mxu1 %v1094_v9 }
  0x5c   : > { %904 = vmatprep.subr.bf16.mxu0 %v1095_v10  ;;  %1011 = vmatprep.subr.bf16.mxu1 %v1095_v10 }
  0x5f   : > { %905 = vmatpush3.bf16.msra.mxu0 %v1096_v13  ;;  %1019 = vmatpush3.bf16.msra.mxu1 %v1096_v13 }
  0x60   : > { %906 = vmatprep.subr.bf16.mxu0 %v1097_v14  ;;  %1012 = vmatprep.subr.bf16.mxu1 %v1097_v14 }
  0x63   : > { %907 = vmatpush3.bf16.msra.mxu0 %v1098_v15  ;;  %1020 = vmatpush3.bf16.msra.mxu1 %v1098_v15 }
  0x64   : > { %908 = vmatprep.subr.bf16.mxu0 %v1099_v16  ;;  %1013 = vmatprep.subr.bf16.mxu1 %v1099_v16 }
  0x67   : > { %909 = vmatpush3.bf16.msra.mxu0 %v1100_v17  ;;  %1021 = vmatpush3.bf16.msra.mxu1 %v1100_v17 }
  0x6a   : > { %568 = vmatmul.mubr.bf16.vlgmr.msra.gmra.mxu0 %v1101_v18  ;;  %632 = vmatmul.mubr.bf16.vlgmr.msra.gmra.mxu1 %v1104_v19 }
  0x6b   : > { %575 = vmatprep.mubr.bf16.mxu0 %v1107_v20  ;;  %639 = vmatprep.mubr.bf16.mxu1 %v1109_v21 }
  0x72   : > { %576 = vmatmul.mubr.bf16.gmra.mxu0 %v1111_v22  ;;  %640 = vmatmul.mubr.bf16.gmra.mxu1 %v1112_v23 }
  0x73   : > { %583 = vmatprep.mubr.bf16.mxu0 %v1113_v24  ;;  %647 = vmatprep.mubr.bf16.mxu1 %v1115_v25 }
  0x7a   : > { %584 = vmatmul.mubr.bf16.gmra.mxu0 %v1117_v26  ;;  %648 = vmatmul.mubr.bf16.gmra.mxu1 %v1118_v27 }
  0x7b   : > { %591 = vmatprep.mubr.bf16.mxu0 %v1119_v28  ;;  %655 = vmatprep.mubr.bf16.mxu1 %v1121_v29 }
  0x82   : > { %592 = vmatmul.mubr.bf16.gmra.mxu0 %v1123_v30  ;;  %656 = vmatmul.mubr.bf16.gmra.mxu1 %v1124_v31 }
  0x83   : > { %599 = vmatprep.mubr.bf16.mxu0 %v1125_v32  ;;  %663 = vmatprep.mubr.bf16.mxu1 %v1127_v33 }
  0x8a   : > { %600 = vmatmul.mubr.bf16.gmra.mxu0 %v1129_v34  ;;  %664 = vmatmul.mubr.bf16.gmra.mxu1 %v1130_v35 }
  0x8b   : > { %607 = vmatprep.mubr.bf16.mxu0 %v1131_v36  ;;  %671 = vmatprep.mubr.bf16.mxu1 %v1133_v37 }
  0x92   : > { %608 = vmatmul.mubr.bf16.gmra.mxu0 %v1135_v38  ;;  %672 = vmatmul.mubr.bf16.gmra.mxu1 %v1136_v39 }
  0x93   : > { %615 = vmatprep.mubr.bf16.mxu0 %v1137_v40  ;;  %679 = vmatprep.mubr.bf16.mxu1 %v1139_v41 }
  0x9a   : > { %616 = vmatmul.mubr.bf16.gmra.mxu0 %v1141_v42  ;;  %680 = vmatmul.mubr.bf16.gmra.mxu1 %v1142_v43 }
  0x9b   : > { %623 = vmatprep.mubr.bf16.mxu0 %v1143_v44  ;;  %687 = vmatprep.mubr.bf16.mxu1 %v1145_v45 }
  0xa2   : > { %624 = vmatmul.mubr.bf16.gmra.mxu0 %v1147_v46  ;;  %688 = vmatmul.mubr.bf16.gmra.mxu1 %v1148_v47 }
 0x12a   : > { %v910_v48 = vpop.f32.mrf.mxu0  ;;  %v958_v49 = vpop.f32.mrf.mxu1 }
 0x12c   : > { %v911_v51 = vpop.f32.mrf.mxu0  ;;  %v959_v52 = vpop.f32.mrf.mxu1 }
 0x12d   : > { %v912_v53 = vadd.f32 %v911_v51, %v910_v48  ;;  %v960_v54 = vadd.f32 %v959_v52, %v958_v49 }
 0x12e   : > { %v913_v55 = vpop.f32.mrf.mxu0  ;;  %v961_v56 = vpop.f32.mrf.mxu1 }
 0x12f   : > { %v570_v57 = vadd.f32 %v912_v53, %v1469_v50  ;;  %v634_v58 = vadd.f32 %v960_v54, %v1469_v50 }
 0x130   : > { %v914_v59 = vpop.f32.mrf.mxu0  ;;  %v962_v60 = vpop.f32.mrf.mxu1 }
 0x131   : > { %696 = vst [vmem:[%s1475_s17] sm:$0xff] %v570_v57  ;;  %712 = vst [vmem:[%s1475_s17 + $0x80] sm:$0xff] %v634_v58  ;;  %v915_v61 = vadd.f32 %v914_v59, %v913_v55  ;;  %v963_v62 = vadd.f32 %v962_v60, %v961_v56 }
 0x132   : > { %v916_v63 = vpop.f32.mrf.mxu0  ;;  %v964_v0 = vpop.f32.mrf.mxu1 }
 0x133   : > { %v573_v1 = vadd.f32 %v915_v61, %v1469_v50  ;;  %v637_v2 = vadd.f32 %v963_v62, %v1469_v50 }
 0x134   : > { %v917_v3 = vpop.f32.mrf.mxu0  ;;  %v965_v4 = vpop.f32.mrf.mxu1 }
 0x135   : > { %697 = vst [vmem:[%s1475_s17 + $0x8] sm:$0xff] %v573_v1  ;;  %713 = vst [vmem:[%s1475_s17 + $0x88] sm:$0xff] %v637_v2  ;;  %v918_v5 = vadd.f32 %v917_v3, %v916_v63  ;;  %v966_v6 = vadd.f32 %v965_v4, %v964_v0 }
 0x136   : > { %v919_v7 = vpop.f32.mrf.mxu0  ;;  %v967_v8 = vpop.f32.mrf.mxu1 }
 0x137   : > { %v578_v9 = vadd.f32 %v918_v5, %v1469_v50  ;;  %v642_v10 = vadd.f32 %v966_v6, %v1469_v50 }
 0x138   : > { %v920_v11 = vpop.f32.mrf.mxu0  ;;  %v968_v12 = vpop.f32.mrf.mxu1 }
 0x139   : > { %698 = vst [vmem:[%s1475_s17 + $0x10] sm:$0xff] %v578_v9  ;;  %714 = vst [vmem:[%s1475_s17 + $0x90] sm:$0xff] %v642_v10  ;;  %v921_v13 = vadd.f32 %v920_v11, %v919_v7  ;;  %v969_v14 = vadd.f32 %v968_v12, %v967_v8 }
 0x13a   : > { %v922_v15 = vpop.f32.mrf.mxu0  ;;  %v970_v16 = vpop.f32.mrf.mxu1 }
 0x13b   : > { %v581_v17 = vadd.f32 %v921_v13, %v1469_v50  ;;  %v645_v18 = vadd.f32 %v969_v14, %v1469_v50 }
 0x13c   : > { %v923_v19 = vpop.f32.mrf.mxu0  ;;  %v971_v20 = vpop.f32.mrf.mxu1 }
 0x13d   : > { %699 = vst [vmem:[%s1475_s17 + $0x18] sm:$0xff] %v581_v17  ;;  %715 = vst [vmem:[%s1475_s17 + $0x98] sm:$0xff] %v645_v18  ;;  %v924_v21 = vadd.f32 %v923_v19, %v922_v15  ;;  %v972_v22 = vadd.f32 %v971_v20, %v970_v16 }
 0x13e   : > { %v925_v23 = vpop.f32.mrf.mxu0  ;;  %v973_v24 = vpop.f32.mrf.mxu1 }
 0x13f   : > { %v586_v25 = vadd.f32 %v924_v21, %v1469_v50  ;;  %v650_v26 = vadd.f32 %v972_v22, %v1469_v50 }
 0x140   : > { %v926_v27 = vpop.f32.mrf.mxu0  ;;  %v974_v28 = vpop.f32.mrf.mxu1 }
 0x141   : > { %700 = vst [vmem:[%s1475_s17 + $0x20] sm:$0xff] %v586_v25  ;;  %716 = vst [vmem:[%s1475_s17 + $0xa0] sm:$0xff] %v650_v26  ;;  %v927_v29 = vadd.f32 %v926_v27, %v925_v23  ;;  %v975_v30 = vadd.f32 %v974_v28, %v973_v24 }
 0x142   : > { %v928_v31 = vpop.f32.mrf.mxu0  ;;  %v976_v32 = vpop.f32.mrf.mxu1 }
 0x143   : > { %v589_v33 = vadd.f32 %v927_v29, %v1469_v50  ;;  %v653_v34 = vadd.f32 %v975_v30, %v1469_v50 }
 0x144   : > { %v929_v35 = vpop.f32.mrf.mxu0  ;;  %v977_v36 = vpop.f32.mrf.mxu1 }
 0x145   : > { %701 = vst [vmem:[%s1475_s17 + $0x28] sm:$0xff] %v589_v33  ;;  %717 = vst [vmem:[%s1475_s17 + $0xa8] sm:$0xff] %v653_v34  ;;  %v930_v37 = vadd.f32 %v929_v35, %v928_v31  ;;  %v978_v38 = vadd.f32 %v977_v36, %v976_v32 }
 0x146   : > { %v931_v39 = vpop.f32.mrf.mxu0  ;;  %v979_v40 = vpop.f32.mrf.mxu1 }
 0x147   : > { %v594_v41 = vadd.f32 %v930_v37, %v1469_v50  ;;  %v658_v42 = vadd.f32 %v978_v38, %v1469_v50 }
 0x148   : > { %v932_v43 = vpop.f32.mrf.mxu0  ;;  %v980_v44 = vpop.f32.mrf.mxu1 }
 0x149   : > { %702 = vst [vmem:[%s1475_s17 + $0x30] sm:$0xff] %v594_v41  ;;  %718 = vst [vmem:[%s1475_s17 + $0xb0] sm:$0xff] %v658_v42  ;;  %v933_v45 = vadd.f32 %v932_v43, %v931_v39  ;;  %v981_v46 = vadd.f32 %v980_v44, %v979_v40 }
 0x14a   : > { %v934_v47 = vpop.f32.mrf.mxu0  ;;  %v982_v48 = vpop.f32.mrf.mxu1 }
 0x14b   : > { %v597_v49 = vadd.f32 %v933_v45, %v1469_v50  ;;  %v661_v51 = vadd.f32 %v981_v46, %v1469_v50 }
 0x14c   : > { %v935_v52 = vpop.f32.mrf.mxu0  ;;  %v983_v53 = vpop.f32.mrf.mxu1 }
 0x14d   : > { %703 = vst [vmem:[%s1475_s17 + $0x38] sm:$0xff] %v597_v49  ;;  %719 = vst [vmem:[%s1475_s17 + $0xb8] sm:$0xff] %v661_v51  ;;  %v936_v54 = vadd.f32 %v935_v52, %v934_v47  ;;  %v984_v55 = vadd.f32 %v983_v53, %v982_v48 }
 0x14e   : > { %v937_v56 = vpop.f32.mrf.mxu0  ;;  %v985_v57 = vpop.f32.mrf.mxu1 }
 0x14f   : > { %v602_v58 = vadd.f32 %v936_v54, %v1469_v50  ;;  %v666_v59 = vadd.f32 %v984_v55, %v1469_v50 }
 0x150   : > { %v938_v60 = vpop.f32.mrf.mxu0  ;;  %v986_v61 = vpop.f32.mrf.mxu1 }
 0x151   : > { %704 = vst [vmem:[%s1475_s17 + $0x40] sm:$0xff] %v602_v58  ;;  %720 = vst [vmem:[%s1475_s17 + $0xc0] sm:$0xff] %v666_v59  ;;  %v939_v62 = vadd.f32 %v938_v60, %v937_v56  ;;  %v987_v63 = vadd.f32 %v986_v61, %v985_v57 }
 0x152   : > { %v940_v0 = vpop.f32.mrf.mxu0  ;;  %v988_v1 = vpop.f32.mrf.mxu1 }
 0x153   : > { %v605_v2 = vadd.f32 %v939_v62, %v1469_v50  ;;  %v669_v3 = vadd.f32 %v987_v63, %v1469_v50 }
 0x154   : > { %v941_v4 = vpop.f32.mrf.mxu0  ;;  %v989_v5 = vpop.f32.mrf.mxu1 }
 0x155   : > { %705 = vst [vmem:[%s1475_s17 + $0x48] sm:$0xff] %v605_v2  ;;  %721 = vst [vmem:[%s1475_s17 + $0xc8] sm:$0xff] %v669_v3  ;;  %v942_v6 = vadd.f32 %v941_v4, %v940_v0  ;;  %v990_v7 = vadd.f32 %v989_v5, %v988_v1 }
 0x156   : > { %v943_v8 = vpop.f32.mrf.mxu0  ;;  %v991_v9 = vpop.f32.mrf.mxu1 }
 0x157   : > { %v610_v10 = vadd.f32 %v942_v6, %v1469_v50  ;;  %v674_v11 = vadd.f32 %v990_v7, %v1469_v50 }
 0x158   : > { %v944_v12 = vpop.f32.mrf.mxu0  ;;  %v992_v13 = vpop.f32.mrf.mxu1 }
 0x159   : > { %706 = vst [vmem:[%s1475_s17 + $0x50] sm:$0xff] %v610_v10  ;;  %722 = vst [vmem:[%s1475_s17 + $0xd0] sm:$0xff] %v674_v11  ;;  %v945_v14 = vadd.f32 %v944_v12, %v943_v8  ;;  %v993_v15 = vadd.f32 %v992_v13, %v991_v9 }
 0x15a   : > { %v946_v16 = vpop.f32.mrf.mxu0  ;;  %v994_v17 = vpop.f32.mrf.mxu1 }
 0x15b   : > { %v613_v18 = vadd.f32 %v945_v14, %v1469_v50  ;;  %v677_v19 = vadd.f32 %v993_v15, %v1469_v50 }
 0x15c   : > { %v947_v20 = vpop.f32.mrf.mxu0  ;;  %v995_v21 = vpop.f32.mrf.mxu1 }
 0x15d   : > { %707 = vst [vmem:[%s1475_s17 + $0x58] sm:$0xff] %v613_v18  ;;  %723 = vst [vmem:[%s1475_s17 + $0xd8] sm:$0xff] %v677_v19  ;;  %v948_v22 = vadd.f32 %v947_v20, %v946_v16  ;;  %v996_v23 = vadd.f32 %v995_v21, %v994_v17 }
 0x15e   : > { %v949_v24 = vpop.f32.mrf.mxu0  ;;  %v997_v25 = vpop.f32.mrf.mxu1 }
 0x15f   : > { %v618_v26 = vadd.f32 %v948_v22, %v1469_v50  ;;  %v682_v27 = vadd.f32 %v996_v23, %v1469_v50 }
 0x160   : > { %v950_v28 = vpop.f32.mrf.mxu0  ;;  %v998_v29 = vpop.f32.mrf.mxu1 }
 0x161   : > { %708 = vst [vmem:[%s1475_s17 + $0x60] sm:$0xff] %v618_v26  ;;  %724 = vst [vmem:[%s1475_s17 + $0xe0] sm:$0xff] %v682_v27  ;;  %v951_v30 = vadd.f32 %v950_v28, %v949_v24  ;;  %v999_v31 = vadd.f32 %v998_v29, %v997_v25 }
 0x162   : > { %v952_v32 = vpop.f32.mrf.mxu0  ;;  %v1000_v33 = vpop.f32.mrf.mxu1 }
 0x163   : > { %v621_v34 = vadd.f32 %v951_v30, %v1469_v50  ;;  %v685_v35 = vadd.f32 %v999_v31, %v1469_v50 }
 0x164   : > { %v953_v36 = vpop.f32.mrf.mxu0  ;;  %v1001_v37 = vpop.f32.mrf.mxu1 }
 0x165   : > { %709 = vst [vmem:[%s1475_s17 + $0x68] sm:$0xff] %v621_v34  ;;  %725 = vst [vmem:[%s1475_s17 + $0xe8] sm:$0xff] %v685_v35  ;;  %v954_v38 = vadd.f32 %v953_v36, %v952_v32  ;;  %v1002_v39 = vadd.f32 %v1001_v37, %v1000_v33 }
 0x166   : > { %v955_v40 = vpop.f32.mrf.mxu0  ;;  %v1003_v41 = vpop.f32.mrf.mxu1 }
 0x167   : > { %v626_v42 = vadd.f32 %v954_v38, %v1469_v50  ;;  %v690_v43 = vadd.f32 %v1002_v39, %v1469_v50 }
 0x168   : > { %v956_v44 = vpop.f32.mrf.mxu0  ;;  %v1004_v45 = vpop.f32.mrf.mxu1 }
 0x169   : > { %710 = vst [vmem:[%s1475_s17 + $0x70] sm:$0xff] %v626_v42  ;;  %726 = vst [vmem:[%s1475_s17 + $0xf0] sm:$0xff] %v690_v43  ;;  %v957_v46 = vadd.f32 %v956_v44, %v955_v40  ;;  %v1005_v47 = vadd.f32 %v1004_v45, %v1003_v41 }
 0x16b   : > { %v629_v48 = vadd.f32 %v957_v46, %v1469_v50  ;;  %v693_v49 = vadd.f32 %v1005_v47, %v1469_v50 }
 0x16d   : > { %711 = vst [vmem:[%s1475_s17 + $0x78] sm:$0xff] %v629_v48  ;;  %727 = vst [vmem:[%s1475_s17 + $0xf8] sm:$0xff] %v693_v49 }
 0x16e   : > { %1216 = shalt.err (!%p1213_p0)
}
 0x16f   : > { %s1217_s11 = scalar_lea.hbm %s1540_s4, 4096  ;;  %s1221_s28 = scalar_lea.hbm %s1592_s3, 8192 }
 0x170   : > { %p1218_p5 = scmp.ne.s32.totalorder %s1540_s4, %s1217_s11  ;;  %p1222_p4 = scmp.lt.s32.totalorder %s1540_s4, %s1592_s3 }
 0x171   : > { %p1223_p6 = scmp.lt.s32.totalorder %s1221_s28, %s1217_s11 }
 0x172   : > { %p1219_p9 = pnand %p1218_p5, %p1608_p11 }
 0x173   : > { %p1224_p8 = por %p1223_p6, %p1222_p4 }
 0x174   : > { %p1220_p1 = pneg %p1219_p9 }
 0x176   : > { %p1225_p3 = pnand %p1224_p8, %p1220_p1 }
 0x178   : > { %1228 = shalt.err (!%p1225_p3)
}
 0x179   : > { %s1280_s20 = smov 128   ;;  %s1281_s17 = smov 8  }
 0x17a   : > { %1028 = dma.vmem_to_hbm [thread:$0]  (%p1608_p11), %s1542_s23, 4096, %s1540_s4, %s729_s16, %s1280_s20, %s1280_s20, %s1281_s17  }
 0x17b PF: > { %s757_s22 = sand.u32 1, %s1259_s12   ;;  %p1609_p7 = scmp.ne.s32.totalorder %s1598_s19, 0 }
 0x17c   : > { %p1610_p12 = scmp.ge.s32.totalorder %s1271_s15, 2  ;;  %s758_s25 = scalar_lea.sflag [#allocation4], %s757_s22 }
 0x17e   : > { %p1039_p10 = pnand %p1610_p12, %p1609_p7 }
 0x180   : > { %p1040_p2 = pneg %p1039_p10 }
 0x182   : > { %1254 = dma.done.wait (%p1040_p2), %s758_s25, 4096  }
 0x183   : > { %1256 = vsyncadd (%p1040_p2), %s758_s25, 4294963200  ;;  %p17_p13 = scmp.ge.s32.totalorder %s1356_s24, 4   ;;  %s1611_s12 = smov %s1263_s13 }
 0x184   : > { %s1612_s13 = smov %s1267_s14  ;;  %s1613_s14 = smov %s1373_s5 }
 0x185   : > { %s1614_s15 = smov %s1356_s24  ;;  %19 = sbr.rel (!%p17_p13) target bundleno = 6 (0x6), region = 81 }
 0x18a   :  { %763 = vsyncpa [#allocation3], 1 }
 0x18b   :  { %765 = vsyncpa [#allocation3 + $0x1], 1 }
 0x18c   :  { %766 = vsyncpa [#allocation6], 1 }
 0x18d   :  { %767 = vsyncpa [#allocation4], 1 }
 0x18e   :  { %769 = vsyncpa [#allocation4 + $0x1], 1 }

</bundles_post_ra>
